<compile_context>
chip_gen: v7x
topology: tpu7x:2x2x1
jax: 0.10.0
libtpu: 0.0.40
codegen_flags: <defaults>
</compile_context>

<pallas_src>
import functools

import jax
import jax.numpy as jnp
import numpy as np
from jax.experimental import pallas as pl
from jax.experimental.pallas import tpu as pltpu


def _round_up(x, m):
    return ((x + m - 1) // m) * m


def _pick_row_tile(rows, lanes, budget_bytes=2 * 1024 * 1024):
    """Largest multiple-of-8 divisor of `rows` under a per-block VMEM budget.

    Caps the block at `budget_bytes` (f32, double-buffered by Pallas) so the
    kernel scales to real feature maps on v7x (64 MiB VMEM), and keeps at
    least 2 grid steps when possible so the pipeline actually overlaps.
    """
    cap = max(8, budget_bytes // (lanes * 4))
    cap = min(cap, rows)
    if rows >= 16:
        cap = min(cap, max(8, rows // 2))   # >= 2 grid steps for pipelining
    cap = max(8, (cap // 8) * 8)
    best = 8
    t = 8
    while t <= cap:
        if rows % t == 0:
            best = t
        t += 8
    return best


# ---------------------------------------------------------------------------
# Kernel 1: global average pool per row (row = one (b, c) pair).
#   x_ref      : (TR, L_pad)   lane-dense spatial slab (zeros in padded lanes)
#   pooled_ref : (TR, 1)       per-row mean
# ---------------------------------------------------------------------------
def _se_pool_kernel(x_ref, pooled_ref, *, inv_hw):
    x = x_ref[...].astype(jnp.float32)
    # Padded lanes are zero, so the sum is exact; divide by the TRUE H*W.
    pooled_ref[...] = jnp.sum(x, axis=-1, keepdims=True) * inv_hw


# ---------------------------------------------------------------------------
# Kernel 2: broadcast per-row scale over the spatial (lane) axis.
#   x_ref     : (TR, L_pad)
#   scale_ref : (TR, 1)
#   o_ref     : (TR, L_pad)
# ---------------------------------------------------------------------------
def _se_scale_kernel(x_ref, scale_ref, o_ref):
    o_ref[...] = (x_ref[...] * scale_ref[...]).astype(o_ref.dtype)


# ---------------------------------------------------------------------------
# Wrapper
# ---------------------------------------------------------------------------
def se_layer_forward(x, w1, w2):
    """x: (B, C, H, W); w1: (C//r, C); w2: (C, C//r)  (PyTorch Linear weights)."""
    B, C, H, W = x.shape
    L = H * W
    rows = B * C

    L_pad = _round_up(L, 128)
    TR = _pick_row_tile(rows, L_pad)
    rows_pad = _round_up(rows, TR)

    x2 = x.reshape(rows, L)                      # free view of contiguous NCHW
    if (rows_pad != rows) or (L_pad != L):
        x2 = jnp.pad(x2, ((0, rows_pad - rows), (0, L_pad - L)))

    grid = (rows_pad // TR,)
    cparams = pltpu.CompilerParams(dimension_semantics=("parallel",))

    # --- pass 1: global average pool (one lane-dense read of x) ---
    pooled = pl.pallas_call(
        functools.partial(_se_pool_kernel, inv_hw=1.0 / L),
        out_shape=jax.ShapeDtypeStruct((rows_pad, 1), jnp.float32),
        grid=grid,
        in_specs=[pl.BlockSpec((TR, L_pad), lambda i: (i, 0))],
        out_specs=pl.BlockSpec((TR, 1), lambda i: (i, 0)),
        compiler_params=cparams,
    )(x2)

    # --- excitation FC: (B, C) -> (B, C//r) -> (B, C); ~1K MACs, <1 KB HBM.
    # Done in plain JAX (XLA fuses it); negligible vs. the HBM-bound passes.
    p = pooled[:rows, 0].reshape(B, C)
    h = jnp.maximum(jnp.dot(p, w1.T, preferred_element_type=jnp.float32), 0.0)
    s = jax.nn.sigmoid(jnp.dot(h, w2.T, preferred_element_type=jnp.float32))
    scale = s.reshape(rows, 1).astype(jnp.float32)
    if rows_pad != rows:
        scale = jnp.pad(scale, ((0, rows_pad - rows), (0, 0)))

    # --- pass 2: broadcast-multiply (second read of x, one lane-dense write) ---
    out2 = pl.pallas_call(
        _se_scale_kernel,
        out_shape=jax.ShapeDtypeStruct((rows_pad, L_pad), x.dtype),
        grid=grid,
        in_specs=[pl.BlockSpec((TR, L_pad), lambda i: (i, 0)),
                  pl.BlockSpec((TR, 1), lambda i: (i, 0))],
        out_specs=pl.BlockSpec((TR, L_pad), lambda i: (i, 0)),
        compiler_params=cparams,
    )(x2, scale)

    return out2[:rows, :L].reshape(B, C, H, W)


# ---------------------------------------------------------------------------
# Pure-JAX reference (mirrors the PyTorch SELayer exactly)
# ---------------------------------------------------------------------------
def se_reference(x, w1, w2):
    y = jnp.mean(x, axis=(2, 3))                         # AdaptiveAvgPool2d(1)
    y = jnp.maximum(y @ w1.T, 0.0)                       # Linear + ReLU
    y = jax.nn.sigmoid(y @ w2.T)                         # Linear + Sigmoid
    return x * y[:, :, None, None]


if __name__ == "__main__":
    key = jax.random.PRNGKey(0)
    B, C, H, W = 2, 64, 16, 16
    reduction = 16
    Cr = C // reduction

    k = jax.random.split(key, 3)
    x = jax.random.normal(k[0], (B, C, H, W), jnp.float32)
    # nn.Linear weight layout: (out_features, in_features), no bias.
    w1 = jax.random.normal(k[1], (Cr, C), jnp.float32) * 0.2
    w2 = jax.random.normal(k[2], (C, Cr), jnp.float32) * 0.2

    fwd = jax.jit(se_layer_forward)
    out = jax.block_until_ready(fwd(x, w1, w2))
    ref = jax.block_until_ready(se_reference(x, w1, w2))

    assert out.shape == (B, C, H, W)
    np.testing.assert_allclose(np.asarray(out), np.asarray(ref),
                               rtol=1e-5, atol=1e-5)
    print("KERNEL_OK")
</pallas_src>

<mosaic_0001>
module attributes {stable_mosaic.version = 11 : i64} {
  func.func @_se_pool_kernel(%arg0: i32, %arg1: memref<64x256xf32, #tpu.memory_space<vmem>>, %arg2: memref<64x1xf32, #tpu.memory_space<vmem>>) attributes {dimension_semantics = [#tpu.dimension_semantics<parallel>], iteration_bounds = array<i64: 2>, scalar_prefetch = 0 : i64, scratch_operands = 0 : i64, tpu.core_type = #tpu.core_type<tc>, window_params = [{transform_indices = @transform_0, window_bounds = array<i64: 64, 256>}, {transform_indices = @transform_1, window_bounds = array<i64: 64, 1>}]} {
    %c0 = arith.constant 0 : index
    %c0_0 = arith.constant 0 : index
    %0 = vector.load %arg1[%c0, %c0_0] : memref<64x256xf32, #tpu.memory_space<vmem>>, vector<64x256xf32>
    %cst = arith.constant dense<0.000000e+00> : vector<64xf32>
    %1 = vector.multi_reduction <add>, %0, %cst [1] : vector<64x256xf32> to vector<64xf32>
    %2 = vector.shape_cast %1 : vector<64xf32> to vector<64x1xf32>
    %cst_1 = arith.constant 3.906250e-03 : f32
    %3 = vector.broadcast %cst_1 : f32 to vector<64x1xf32>
    %4 = arith.mulf %2, %3 : vector<64x1xf32>
    %c0_2 = arith.constant 0 : index
    %c0_3 = arith.constant 0 : index
    %5 = vector.load %arg2[%c0_2, %c0_3] : memref<64x1xf32, #tpu.memory_space<vmem>>, vector<64x1xf32>
    tpu.vector_store %arg2[%c0_2, %c0_3], %4 {strides = array<i32>} : memref<64x1xf32, #tpu.memory_space<vmem>>, vector<64x1xf32>,
    return
  }
  func.func @transform_0(%arg0: i32) -> (i32, i32) {
    %c0_i32 = arith.constant 0 : i32
    %c0_i32_0 = arith.constant 0 : i32
    return %arg0, %c0_i32 : i32, i32
  }
  func.func @transform_1(%arg0: i32) -> (i32, i32) {
    %c0_i32 = arith.constant 0 : i32
    %c0_i32_0 = arith.constant 0 : i32
    return %arg0, %c0_i32 : i32, i32
  }
}

module attributes {stable_mosaic.version = 11 : i64} {
  func.func @_se_scale_kernel(%arg0: i32, %arg1: memref<64x256xf32, #tpu.memory_space<vmem>>, %arg2: memref<64x1xf32, #tpu.memory_space<vmem>>, %arg3: memref<64x256xf32, #tpu.memory_space<vmem>>) attributes {dimension_semantics = [#tpu.dimension_semantics<parallel>], iteration_bounds = array<i64: 2>, scalar_prefetch = 0 : i64, scratch_operands = 0 : i64, tpu.core_type = #tpu.core_type<tc>, window_params = [{transform_indices = @transform_0, window_bounds = array<i64: 64, 256>}, {transform_indices = @transform_1, window_bounds = array<i64: 64, 1>}, {transform_indices = @transform_2, window_bounds = array<i64: 64, 256>}]} {
    %c0 = arith.constant 0 : index
    %c0_0 = arith.constant 0 : index
    %0 = vector.load %arg1[%c0, %c0_0] : memref<64x256xf32, #tpu.memory_space<vmem>>, vector<64x256xf32>
    %c0_1 = arith.constant 0 : index
    %c0_2 = arith.constant 0 : index
    %1 = vector.load %arg2[%c0_1, %c0_2] : memref<64x1xf32, #tpu.memory_space<vmem>>, vector<64x1xf32>
    %2 = vector.broadcast %1 : vector<64x1xf32> to vector<64x256xf32>
    %3 = arith.mulf %0, %2 : vector<64x256xf32>
    %c0_3 = arith.constant 0 : index
    %c0_4 = arith.constant 0 : index
    %4 = vector.load %arg3[%c0_3, %c0_4] : memref<64x256xf32, #tpu.memory_space<vmem>>, vector<64x256xf32>
    tpu.vector_store %arg3[%c0_3, %c0_4], %3 {strides = array<i32>} : memref<64x256xf32, #tpu.memory_space<vmem>>, vector<64x256xf32>,
    return
  }
  func.func @transform_0(%arg0: i32) -> (i32, i32) {
    %c0_i32 = arith.constant 0 : i32
    %c0_i32_0 = arith.constant 0 : i32
    return %arg0, %c0_i32 : i32, i32
  }
  func.func @transform_1(%arg0: i32) -> (i32, i32) {
    %c0_i32 = arith.constant 0 : i32
    %c0_i32_0 = arith.constant 0 : i32
    return %arg0, %c0_i32 : i32, i32
  }
  func.func @transform_2(%arg0: i32) -> (i32, i32) {
    %c0_i32 = arith.constant 0 : i32
    %c0_i32_0 = arith.constant 0 : i32
    return %arg0, %c0_i32 : i32, i32
  }
}

</mosaic_0001>

<bundles_post_ra>
// kernel: squeeze.1
= control target key start
LH: loop header
LB: loop body
LE: loop exit
PB: predicated region body
PF: predicated region fallthrough
CT: control target
= control target key end

     0   :  { %vm19_vm0 = vcmask 523264   ;;  %v38_v6 = vmov 0.0   ;;  %s55_s0 = inlined_call_operand.vmem [shape: bf16[128], index: 0, kind: input, shape index: {}]   ;;  %s56_s1 = inlined_call_operand.vmem [shape: bf16[2,64], index: 1, kind: output, shape index: {}]  }
   0x1   :  { %v14_v0 = vld [vmem:[%s55_s0] sm:$0x1]  ;;  %s37_s0 = smov 64  }
   0x2   :  { %v15_v1 = vunpack.c.l.bf16 %v14_v0 }
   0x4   :  { %17 = vst [vmem:[#allocation1] sm:$0x3] %v15_v1 }
   0xb   :  { %v21_v2 = vld [vmem:[#allocation1] sm:$0x1]  }
   0xc   :  { %v18_v3 = vld [vmem:[#allocation1] sm:$0x1]   ;;  %22 = vrot.lane.b32.xlu0 %v21_v2, %s37_s0 }
   0xd   :  { %20 = vst.msk [vmem:[#allocation0] sm:$0x1] %vm19_vm0, %v18_v3  }
  0x7e   :  { %v23_v4 = vpop.permute.xlu0 %22  }
  0x7f   :  { %26 = vst.msk [vmem:[#allocation0 + $0x1] sm:$0x1] %vm19_vm0, %v23_v4  }
  0x86   :  { %v31_v5 = vld [vmem:[#allocation0] sm:$0x3] }
  0x87   :  { %v32_v7 = vpack.c.bf16 %v38_v6, %v31_v5 }
  0x89   :  { %34 = vst [vmem:[%s56_s1] sm:$0x1] %v32_v7 }

// kernel: se_layer_forward.2
= control target key start
LH: loop header
LB: loop body
LE: loop exit
PB: predicated region body
PF: predicated region fallthrough
CT: control target
= control target key end

     0   :  { %s275_s6 = smov 0   ;;  %s304_s0 = inlined_call_operand.vmem [shape: f32[128,256], index: 0, kind: input, shape index: {}]   ;;  %s305_s1 = inlined_call_operand.vmem [shape: f32[128,1], index: 1, kind: output, shape index: {}]  }
   0x1 LB: > { %s236_s7 = sadd.s32 4294967295, %s263_s6   ;;  %p240_p0 = scmp.ge.s32.totalorder %s263_s6, 1  ;;  %s263_s6 = sphi %s275_s6, %s11_s6  }
   0x2   : > { %p89_p1 = scmp.lt.s32.totalorder %s263_s6, 3 }
   0x4   : > { %p90_p2 = pnand %p240_p0, %p89_p1 }
   0x5   : > { %s241_s8 = sshll.u32 (!%p90_p2), %s236_s7, 3  ;;  %vm171_vm0 = vcmask (!%p90_p2), 7168  }
   0x6   : > { %93 = sbr.rel (%p90_p2) target bundleno = 177 (0xb1), region = 24  ;;  %p111_p3 = scmp.lt.s32.totalorder (!%p90_p2), %s241_s8, 15 }
   0xd   : > { %s307_s8 = smov (!%p111_p3, %s241_s8), 15 }
   0xe   : > { %s248_s9 = sshll.u32 %s307_s8, 4  ;;  %s245_s13 = sshll.u32 %s307_s8, 3 }
   0xf   : > { %s115_s12 = scalar_lea.vmem %s304_s0, %s248_s9  ;;  %s121_s16 = scalar_lea.vmem %s305_s1, %s245_s13 }
  0x10   : > { %v127_v0 = vld [vmem:[%s115_s12 + $0x20] sm:$0xff]  ;;  %v128_v1 = vld [vmem:[%s115_s12 + $0x28] sm:$0xff]  ;;  %v129_v5 = vld [vmem:[%s115_s12 + $0x30] sm:$0xff] }
  0x11   : > { %v123_v2 = vld [vmem:[%s115_s12] sm:$0xff]  ;;  %v145_v3 = vadd.f32 %v128_v1, %v127_v0  ;;  %v124_v4 = vld [vmem:[%s115_s12 + $0x8] sm:$0xff]  ;;  %v130_v6 = vld [vmem:[%s115_s12 + $0x38] sm:$0xff] }
  0x12   : > { %v139_v7 = vadd.f32 %v124_v4, %v123_v2  ;;  %v125_v8 = vld [vmem:[%s115_s12 + $0x10] sm:$0xff]  ;;  %v126_v9 = vld [vmem:[%s115_s12 + $0x18] sm:$0xff]  ;;  %v148_v10 = vadd.f32 %v130_v6, %v129_v5  ;;  %v131_v14 = vld [vmem:[%s115_s12 + $0x40] sm:$0xff] }
  0x13   : > { %146 = vadd.xlane.f32.xlu1 %v145_v3  ;;  %v142_v11 = vadd.f32 %v126_v9, %v125_v8  ;;  %v133_v12 = vld [vmem:[%s115_s12 + $0x50] sm:$0xff]  ;;  %v134_v13 = vld [vmem:[%s115_s12 + $0x58] sm:$0xff]  ;;  %v132_v15 = vld [vmem:[%s115_s12 + $0x48] sm:$0xff] }
  0x14   : > { %140 = vadd.xlane.f32.xlu0 %v139_v7  ;;  %v154_v16 = vadd.f32 %v134_v13, %v133_v12  ;;  %v151_v17 = vadd.f32 %v132_v15, %v131_v14  ;;  %v137_v18 = vld [vmem:[%s115_s12 + $0x70] sm:$0xff]  ;;  %v138_v19 = vld [vmem:[%s115_s12 + $0x78] sm:$0xff]  ;;  %v135_v20 = vld [vmem:[%s115_s12 + $0x60] sm:$0xff] }
  0x15   : > { %v136_v21 = vld [vmem:[%s115_s12 + $0x68] sm:$0xff]  ;;  %v160_v22 = vadd.f32 %v138_v19, %v137_v18 }
  0x16   : > { %v157_v23 = vadd.f32 %v136_v21, %v135_v20 }
  0x17   : > { %149 = vadd.xlane.f32.xlu1 %v148_v10 }
  0x18   : > { %143 = vadd.xlane.f32.xlu0 %v142_v11 }
  0x1b   : > { %155 = vadd.xlane.f32.xlu1 %v154_v16 }
  0x1c   : > { %152 = vadd.xlane.f32.xlu0 %v151_v17 }
  0x1f   : > { %161 = vadd.xlane.f32.xlu1 %v160_v22 }
  0x20   : > { %158 = vadd.xlane.f32.xlu0 %v157_v23 }
  0xa0   : > { %v147_v24 = vpop.xlane.xlu1 %146 }
  0xa1   : > { %v165_v25 = vmul.f32 0.00390625, %v147_v24  ;;  %v141_v26 = vpop.xlane.xlu0 %140 }
  0xa2   : > { %v163_v27 = vmul.f32 0.00390625, %v141_v26 }
  0xa3   : > { %174 = vst.msk [vmem:[%s121_s16 + $0x10] sm:$0xff] %vm171_vm0, %v165_v25 }
  0xa4   : > { %172 = vst.msk [vmem:[%s121_s16] sm:$0xff] %vm171_vm0, %v163_v27  ;;  %v150_v28 = vpop.xlane.xlu1 %149 }
  0xa5   : > { %v166_v29 = vmul.f32 0.00390625, %v150_v28  ;;  %v144_v30 = vpop.xlane.xlu0 %143 }
  0xa6   : > { %v164_v31 = vmul.f32 0.00390625, %v144_v30 }
  0xa7   : > { %175 = vst.msk [vmem:[%s121_s16 + $0x18] sm:$0xff] %vm171_vm0, %v166_v29 }
  0xa8   : > { %173 = vst.msk [vmem:[%s121_s16 + $0x8] sm:$0xff] %vm171_vm0, %v164_v31  ;;  %v156_v32 = vpop.xlane.xlu1 %155 }
  0xa9   : > { %v168_v33 = vmul.f32 0.00390625, %v156_v32  ;;  %v153_v34 = vpop.xlane.xlu0 %152 }
  0xaa   : > { %v167_v35 = vmul.f32 0.00390625, %v153_v34 }
  0xab   : > { %177 = vst.msk [vmem:[%s121_s16 + $0x28] sm:$0xff] %vm171_vm0, %v168_v33 }
  0xac   : > { %176 = vst.msk [vmem:[%s121_s16 + $0x20] sm:$0xff] %vm171_vm0, %v167_v35  ;;  %v162_v36 = vpop.xlane.xlu1 %161 }
  0xad   : > { %v170_v37 = vmul.f32 0.00390625, %v162_v36  ;;  %v159_v38 = vpop.xlane.xlu0 %158 }
  0xae   : > { %v169_v39 = vmul.f32 0.00390625, %v159_v38 }
  0xaf   : > { %179 = vst.msk [vmem:[%s121_s16 + $0x38] sm:$0xff] %vm171_vm0, %v170_v37 }
  0xb0   : > { %178 = vst.msk [vmem:[%s121_s16 + $0x30] sm:$0xff] %vm171_vm0, %v169_v39 }
  0xb1 PF: > { %s11_s6 = sadd.s32 1, %s263_s6  }
  0xb2   : > { %p8_p4 = scmp.ge.s32.totalorder %s11_s6, 4  }
  0xb4   :  { %10 = sbr.rel (!%p8_p4) target bundleno = 1 (0x1), region = 54 }

// kernel: se_layer_forward.3
= control target key start
LH: loop header
LB: loop body
LE: loop exit
PB: predicated region body
PF: predicated region fallthrough
CT: control target
= control target key end

     0   :  { %s392_s9 = smov 0   ;;  %s448_s0 = inlined_call_operand.vmem [shape: f32[128,256], index: 0, kind: input, shape index: {}]   ;;  %s449_s1 = inlined_call_operand.vmem [shape: f32[128,1], index: 1, kind: input, shape index: {}]   ;;  %s450_s2 = inlined_call_operand.vmem [shape: f32[128,256], index: 2, kind: output, shape index: {}]  }
   0x1 LB: > { %s340_s10 = sadd.s32 4294967295, %s374_s9   ;;  %p344_p0 = scmp.ge.s32.totalorder %s374_s9, 1  ;;  %s374_s9 = sphi %s392_s9, %s12_s9  }
   0x2   : > { %p125_p1 = scmp.lt.s32.totalorder %s374_s9, 3 }
   0x4   : > { %p126_p2 = pnand %p344_p0, %p125_p1 }
   0x5   : > { %s345_s11 = sshll.u32 (!%p126_p2), %s340_s10, 3  ;;  %v376_v0 = vmov (!%p126_p2), 0  }
   0x6   : > { %129 = sbr.rel (%p126_p2) target bundleno = 161 (0xa1), region = 28  ;;  %367 = vset.pattern.permute.xlu1 (!%p126_p2), %v376_v0  ;;  %366 = vset.pattern.permute.xlu0 (!%p126_p2), %v376_v0  ;;  %p155_p3 = scmp.lt.s32.totalorder (!%p126_p2), %s345_s11, 15 }
   0xd   : > { %s452_s11 = smov (!%p155_p3, %s345_s11), 15 }
   0xe   : > { %s349_s12 = sshll.u32 %s452_s11, 3  ;;  %s355_s16 = sshll.u32 %s452_s11, 4 }
   0xf   : > { %s165_s15 = scalar_lea.vmem %s449_s1, %s349_s12  ;;  %s406_s19 = scalar_lea.vmem %s448_s0, %s355_s16 }
  0x10   : > { %v192_v1 = vld [vmem:[%s165_s15 + $0x10] sm:$0xff]  ;;  %v190_v2 = vld [vmem:[%s165_s15] sm:$0xff]  ;;  %v193_v3 = vld [vmem:[%s165_s15 + $0x18] sm:$0xff]  ;;  %s415_s22 = scalar_lea.vmem %s450_s2, %s355_s16 }
  0x11   : > { %210 = vperm.xlu1 %367, %v192_v1   ;;  %200 = vperm.xlu0 %366, %v190_v2   ;;  %v191_v4 = vld [vmem:[%s165_s15 + $0x8] sm:$0xff]  ;;  %v194_v6 = vld [vmem:[%s165_s15 + $0x20] sm:$0xff]  ;;  %v197_v7 = vld [vmem:[%s165_s15 + $0x38] sm:$0xff] }
  0x12   : > { %v195_v5 = vld [vmem:[%s165_s15 + $0x28] sm:$0xff]  ;;  %v196_v8 = vld [vmem:[%s165_s15 + $0x30] sm:$0xff]  ;;  %v178_v9 = vld [vmem:[%s406_s19 + $0x20] sm:$0xff] }
  0x13   : > { %v179_v10 = vld [vmem:[%s406_s19 + $0x28] sm:$0xff]  ;;  %v174_v11 = vld [vmem:[%s406_s19] sm:$0xff]  ;;  %v180_v19 = vld [vmem:[%s406_s19 + $0x30] sm:$0xff] }
  0x14   : > { %v175_v12 = vld [vmem:[%s406_s19 + $0x8] sm:$0xff]  ;;  %v181_v20 = vld [vmem:[%s406_s19 + $0x38] sm:$0xff]  ;;  %v176_v21 = vld [vmem:[%s406_s19 + $0x10] sm:$0xff] }
  0x15   : > { %215 = vperm.xlu1 %367, %v193_v3   ;;  %205 = vperm.xlu0 %366, %v191_v4   ;;  %v177_v22 = vld [vmem:[%s406_s19 + $0x18] sm:$0xff]  ;;  %v184_v29 = vld [vmem:[%s406_s19 + $0x50] sm:$0xff]  ;;  %v182_v31 = vld [vmem:[%s406_s19 + $0x40] sm:$0xff] }
  0x16   : > { %v185_v30 = vld [vmem:[%s406_s19 + $0x58] sm:$0xff]  ;;  %v183_v32 = vld [vmem:[%s406_s19 + $0x48] sm:$0xff]  ;;  %v188_v39 = vld [vmem:[%s406_s19 + $0x70] sm:$0xff] }
  0x17   : > { %v189_v40 = vld [vmem:[%s406_s19 + $0x78] sm:$0xff]  ;;  %v186_v41 = vld [vmem:[%s406_s19 + $0x60] sm:$0xff]  ;;  %v187_v42 = vld [vmem:[%s406_s19 + $0x68] sm:$0xff] }
  0x19   : > { %225 = vperm.xlu1 %367, %v195_v5   ;;  %220 = vperm.xlu0 %366, %v194_v6  }
  0x1d   : > { %235 = vperm.xlu1 %367, %v197_v7   ;;  %230 = vperm.xlu0 %366, %v196_v8  }
  0x90   : > { %v211_v13 = vpop.permute.xlu1 %210  ;;  %v201_v14 = vpop.permute.xlu0 %200 }
  0x91   : > { %v242_v15 = vmul.f32 %v211_v13, %v178_v9  ;;  %v243_v16 = vmul.f32 %v211_v13, %v179_v10  ;;  %v238_v17 = vmul.f32 %v201_v14, %v174_v11  ;;  %v239_v18 = vmul.f32 %v201_v14, %v175_v12 }
  0x93   : > { %258 = vst [vmem:[%s415_s22 + $0x20] sm:$0xff] %v242_v15  ;;  %259 = vst [vmem:[%s415_s22 + $0x28] sm:$0xff] %v243_v16 }
  0x94   : > { %254 = vst [vmem:[%s415_s22] sm:$0xff] %v238_v17  ;;  %255 = vst [vmem:[%s415_s22 + $0x8] sm:$0xff] %v239_v18  ;;  %v216_v23 = vpop.permute.xlu1 %215  ;;  %v206_v24 = vpop.permute.xlu0 %205 }
  0x95   : > { %v244_v25 = vmul.f32 %v216_v23, %v180_v19  ;;  %v245_v26 = vmul.f32 %v216_v23, %v181_v20  ;;  %v240_v27 = vmul.f32 %v206_v24, %v176_v21  ;;  %v241_v28 = vmul.f32 %v206_v24, %v177_v22 }
  0x97   : > { %260 = vst [vmem:[%s415_s22 + $0x30] sm:$0xff] %v244_v25  ;;  %261 = vst [vmem:[%s415_s22 + $0x38] sm:$0xff] %v245_v26 }
  0x98   : > { %256 = vst [vmem:[%s415_s22 + $0x10] sm:$0xff] %v240_v27  ;;  %257 = vst [vmem:[%s415_s22 + $0x18] sm:$0xff] %v241_v28  ;;  %v226_v33 = vpop.permute.xlu1 %225  ;;  %v221_v34 = vpop.permute.xlu0 %220 }
  0x99   : > { %v248_v35 = vmul.f32 %v226_v33, %v184_v29  ;;  %v249_v36 = vmul.f32 %v226_v33, %v185_v30  ;;  %v246_v37 = vmul.f32 %v221_v34, %v182_v31  ;;  %v247_v38 = vmul.f32 %v221_v34, %v183_v32 }
  0x9b   : > { %264 = vst [vmem:[%s415_s22 + $0x50] sm:$0xff] %v248_v35  ;;  %265 = vst [vmem:[%s415_s22 + $0x58] sm:$0xff] %v249_v36 }
  0x9c   : > { %262 = vst [vmem:[%s415_s22 + $0x40] sm:$0xff] %v246_v37  ;;  %263 = vst [vmem:[%s415_s22 + $0x48] sm:$0xff] %v247_v38  ;;  %v236_v43 = vpop.permute.xlu1 %235  ;;  %v231_v44 = vpop.permute.xlu0 %230 }
  0x9d   : > { %v252_v45 = vmul.f32 %v236_v43, %v188_v39  ;;  %v253_v46 = vmul.f32 %v236_v43, %v189_v40  ;;  %v250_v47 = vmul.f32 %v231_v44, %v186_v41  ;;  %v251_v48 = vmul.f32 %v231_v44, %v187_v42 }
  0x9f   : > { %268 = vst [vmem:[%s415_s22 + $0x70] sm:$0xff] %v252_v45  ;;  %269 = vst [vmem:[%s415_s22 + $0x78] sm:$0xff] %v253_v46 }
  0xa0   : > { %266 = vst [vmem:[%s415_s22 + $0x60] sm:$0xff] %v250_v47  ;;  %267 = vst [vmem:[%s415_s22 + $0x68] sm:$0xff] %v251_v48 }
  0xa1 PF: > { %s12_s9 = sadd.s32 1, %s374_s9  }
  0xa2   : > { %p9_p4 = scmp.ge.s32.totalorder %s12_s9, 4  }
  0xa4   :  { %11 = sbr.rel (!%p9_p4) target bundleno = 1 (0x1), region = 61 }

</bundles_post_ra>
